<compile_context>
chip_gen: v6e
topology: v6e:2x2x1
jax: 0.10.0
libtpu: 0.0.40
codegen_flags: <defaults>
</compile_context>

<pallas_src>
import functools

import jax
import jax.numpy as jnp
from jax.experimental import pallas as pl
from jax.experimental.pallas import tpu as pltpu

BN_EPS = 1e-5
LEAKY_SLOPE = 0.01                 # nn.LeakyReLU() default
_VMEM_LIMIT = 32 * 1024 * 1024     # conservative scoped-VMEM budget (ok on v5e/v6e/v7x)


# ---------------------------------------------------------------------------
# Kernels
# ---------------------------------------------------------------------------
def _fc1_stats_kernel(x_ref, w1_ref, b1_ref, h_ref, sum_ref, sq_ref):
    """One batch tile: h = x @ w1 + b1 ; accumulate per-feature sum / sum-of-squares."""
    i = pl.program_id(0)

    @pl.when(i == 0)
    def _init():
        sum_ref[...] = jnp.zeros_like(sum_ref)
        sq_ref[...] = jnp.zeros_like(sq_ref)

    # bf16 MXU matmul, f32 accumulation; bias add + stats in f32.
    h = jnp.dot(x_ref[...], w1_ref[...],
                preferred_element_type=jnp.float32) + b1_ref[...]
    h_ref[...] = h
    sum_ref[...] += jnp.sum(h, axis=0, keepdims=True)
    sq_ref[...] += jnp.sum(h * h, axis=0, keepdims=True)


def _bn_fc2_kernel(h_ref, sum_ref, sq_ref, gamma_ref, beta_ref, w2_ref, b2_ref,
                   o_ref, *, inv_batch):
    """One batch tile: BatchNorm (batch stats, folded scale/shift) -> LeakyReLU -> fc2."""
    mean = sum_ref[...] * inv_batch                        # (1, H) f32
    var = sq_ref[...] * inv_batch - mean * mean            # biased variance (training BN)
    scale = gamma_ref[...] * jax.lax.rsqrt(var + BN_EPS)   # EUP rsqrt, f32
    shift = beta_ref[...] - mean * scale
    h_bn = h_ref[...] * scale + shift
    a = jnp.where(h_bn >= 0, h_bn, LEAKY_SLOPE * h_bn)
    o_ref[...] = jnp.dot(a.astype(jnp.bfloat16), w2_ref[...],
                         preferred_element_type=jnp.float32) + b2_ref[...]


# ---------------------------------------------------------------------------
# Wrapper
# ---------------------------------------------------------------------------
def _pick_block_b(batch):
    for tb in (512, 256, 128, 64, 32, 16, 8):
        if batch % tb == 0:
            return tb
    return batch  # tiny / odd batch: single block (block == full dim is legal)


def mlp_forward(x, params, block_b=None):
    w1, b1, gamma, beta, w2, b2 = params
    batch, d_in = x.shape
    hidden = w1.shape[1]
    d_out = w2.shape[1]

    if block_b is None:
        block_b = _pick_block_b(batch)
    assert batch % block_b == 0, "batch must be divisible by block_b"
    n_tiles = batch // block_b

    # bf16 matmul inputs (MXU-native on all generations); f32 accumulation.
    x_bf = x.astype(jnp.bfloat16)
    w1_bf = w1.astype(jnp.bfloat16)

    # Lane-dense output: pad D_out up to a multiple of 128 (zero columns),
    # slice back after the call.
    d_pad = ((d_out + 127) // 128) * 128
    w2_bf = jnp.pad(w2, ((0, 0), (0, d_pad - d_out))).astype(jnp.bfloat16)
    b2_p = jnp.pad(b2, ((0, 0), (0, d_pad - d_out)))

    # ---- pass 1: fc1 + batch-stat accumulation over the batch grid ----------
    h, h_sum, h_sq = pl.pallas_call(
        _fc1_stats_kernel,
        out_shape=(
            jax.ShapeDtypeStruct((batch, hidden), jnp.float32),
            jax.ShapeDtypeStruct((1, hidden), jnp.float32),
            jax.ShapeDtypeStruct((1, hidden), jnp.float32),
        ),
        grid=(n_tiles,),
        in_specs=[
            pl.BlockSpec((block_b, d_in), lambda i: (i, 0)),     # x tile
            pl.BlockSpec((d_in, hidden), lambda i: (0, 0)),      # w1 resident
            pl.BlockSpec((1, hidden), lambda i: (0, 0)),         # b1 resident
        ],
        out_specs=(
            pl.BlockSpec((block_b, hidden), lambda i: (i, 0)),   # h tile
            pl.BlockSpec((1, hidden), lambda i: (0, 0)),         # sum accumulator
            pl.BlockSpec((1, hidden), lambda i: (0, 0)),         # sum-of-squares acc
        ),
        compiler_params=pltpu.CompilerParams(
            dimension_semantics=("arbitrary",),   # batch axis reduces into stats
            vmem_limit_bytes=_VMEM_LIMIT),
    )(x_bf, w1_bf, b1)

    # ---- pass 2: BN normalize + LeakyReLU + fc2 (batch tiles independent) ---
    out_p = pl.pallas_call(
        functools.partial(_bn_fc2_kernel, inv_batch=1.0 / batch),
        out_shape=jax.ShapeDtypeStruct((batch, d_pad), jnp.float32),
        grid=(n_tiles,),
        in_specs=[
            pl.BlockSpec((block_b, hidden), lambda i: (i, 0)),   # h tile
            pl.BlockSpec((1, hidden), lambda i: (0, 0)),         # sum
            pl.BlockSpec((1, hidden), lambda i: (0, 0)),         # sum of squares
            pl.BlockSpec((1, hidden), lambda i: (0, 0)),         # gamma
            pl.BlockSpec((1, hidden), lambda i: (0, 0)),         # beta
            pl.BlockSpec((hidden, d_pad), lambda i: (0, 0)),     # w2 resident
            pl.BlockSpec((1, d_pad), lambda i: (0, 0)),          # b2 resident
        ],
        out_specs=pl.BlockSpec((block_b, d_pad), lambda i: (i, 0)),
        compiler_params=pltpu.CompilerParams(
            dimension_semantics=("parallel",),    # independent tiles -> megacore
            vmem_limit_bytes=_VMEM_LIMIT),
    )(h, h_sum, h_sq, gamma, beta, w2_bf, b2_p)

    return out_p[:, :d_out] if d_pad != d_out else out_p


# ---------------------------------------------------------------------------
# Params / reference
# ---------------------------------------------------------------------------
def init_params(key, input_size, hidden_size, output_size):
    """Deterministic PyTorch-style (uniform +-1/sqrt(fan_in)) init, f32 storage."""
    k1, k2, k3, k4 = jax.random.split(key, 4)
    bound1 = 1.0 / (input_size ** 0.5)
    bound2 = 1.0 / (hidden_size ** 0.5)
    w1 = jax.random.uniform(k1, (input_size, hidden_size), jnp.float32, -bound1, bound1)
    b1 = jax.random.uniform(k2, (1, hidden_size), jnp.float32, -bound1, bound1)
    gamma = jnp.ones((1, hidden_size), jnp.float32)   # BatchNorm1d weight
    beta = jnp.zeros((1, hidden_size), jnp.float32)   # BatchNorm1d bias
    w2 = jax.random.uniform(k3, (hidden_size, output_size), jnp.float32, -bound2, bound2)
    b2 = jax.random.uniform(k4, (1, output_size), jnp.float32, -bound2, bound2)
    return (w1, b1, gamma, beta, w2, b2)


def mlp_reference(x, params, matmul_dtype=jnp.float32):
    w1, b1, gamma, beta, w2, b2 = params
    h = jnp.dot(x.astype(matmul_dtype), w1.astype(matmul_dtype),
                preferred_element_type=jnp.float32) + b1
    mean = jnp.mean(h, axis=0, keepdims=True)
    var = jnp.mean((h - mean) ** 2, axis=0, keepdims=True)
    h = (h - mean) * jax.lax.rsqrt(var + BN_EPS) * gamma + beta
    a = jnp.where(h >= 0, h, LEAKY_SLOPE * h)
    return jnp.dot(a.astype(matmul_dtype), w2.astype(matmul_dtype),
                   preferred_element_type=jnp.float32) + b2


# TODO(synk): BatchNorm1d running_mean / running_var buffer updates (a training
# side-effect that does not affect the forward output) are not reproduced.

if __name__ == "__main__":
    # Small, MLP-consistent shapes: batch=64, input=32, hidden=256, output=64.
    B, D_IN, HIDDEN, D_OUT = 64, 32, 256, 64

    key = jax.random.PRNGKey(0)
    kx, kp = jax.random.split(key)
    x = jax.random.normal(kx, (B, D_IN), jnp.float32)
    params = init_params(kp, D_IN, HIDDEN, D_OUT)

    # block_b=16 -> 4 batch tiles: exercises the tiled/accumulated BN path.
    out = mlp_forward(x, params, block_b=16)
    out = jax.block_until_ready(out)

    ref_bf16 = mlp_reference(x, params, matmul_dtype=jnp.bfloat16)  # dtype-matched
    ref_f32 = mlp_reference(x, params, matmul_dtype=jnp.float32)    # module semantics

    assert out.shape == (B, D_OUT)
    assert jnp.allclose(out, ref_bf16, atol=1e-2, rtol=1e-2)
    assert jnp.allclose(out, ref_f32, atol=6e-2, rtol=6e-2)

    print("KERNEL_OK")
</pallas_src>

<mosaic_0001>
module attributes {stable_mosaic.version = 11 : i64} {
  func.func @_fc1_stats_kernel(%arg0: i32, %arg1: memref<16x32xbf16, #tpu.memory_space<vmem>>, %arg2: memref<32x256xbf16, #tpu.memory_space<vmem>>, %arg3: memref<1x256xf32, #tpu.memory_space<vmem>>, %arg4: memref<16x256xf32, #tpu.memory_space<vmem>>, %arg5: memref<1x256xf32, #tpu.memory_space<vmem>>, %arg6: memref<1x256xf32, #tpu.memory_space<vmem>>) attributes {dimension_semantics = [#tpu.dimension_semantics<arbitrary>], iteration_bounds = array<i64: 4>, scalar_prefetch = 0 : i64, scratch_operands = 0 : i64, tpu.core_type = #tpu.core_type<tc>, window_params = [{transform_indices = @transform_0, window_bounds = array<i64: 16, 32>}, {pipeline_mode = #tpu.pipeline_mode<synchronous>, transform_indices = @transform_1, window_bounds = array<i64: 32, 256>}, {pipeline_mode = #tpu.pipeline_mode<synchronous>, transform_indices = @transform_2, window_bounds = array<i64: 1, 256>}, {transform_indices = @transform_3, window_bounds = array<i64: 16, 256>}, {pipeline_mode = #tpu.pipeline_mode<synchronous>, transform_indices = @transform_4, window_bounds = array<i64: 1, 256>}, {pipeline_mode = #tpu.pipeline_mode<synchronous>, transform_indices = @transform_5, window_bounds = array<i64: 1, 256>}]} {
    %c0_i32 = arith.constant 0 : i32
    %0 = arith.cmpi eq, %arg0, %c0_i32 : i32
    %1 = arith.extui %0 : i1 to i32
    %c0_i32_0 = arith.constant 0 : i32
    %2 = arith.cmpi ne, %1, %c0_i32_0 : i32
    scf.if %2 {
      %cst_18 = arith.constant 0.000000e+00 : f32
      %21 = vector.broadcast %cst_18 : f32 to vector<1x256xf32>
      %c0_19 = arith.constant 0 : index
      %c0_20 = arith.constant 0 : index
      %22 = vector.load %arg5[%c0_19, %c0_20] : memref<1x256xf32, #tpu.memory_space<vmem>>, vector<1x256xf32>
      tpu.vector_store %arg5[%c0_19, %c0_20], %21 {strides = array<i32>} : memref<1x256xf32, #tpu.memory_space<vmem>>, vector<1x256xf32>,
      %cst_21 = arith.constant 0.000000e+00 : f32
      %23 = vector.broadcast %cst_21 : f32 to vector<1x256xf32>
      %c0_22 = arith.constant 0 : index
      %c0_23 = arith.constant 0 : index
      %24 = vector.load %arg6[%c0_22, %c0_23] : memref<1x256xf32, #tpu.memory_space<vmem>>, vector<1x256xf32>
      tpu.vector_store %arg6[%c0_22, %c0_23], %23 {strides = array<i32>} : memref<1x256xf32, #tpu.memory_space<vmem>>, vector<1x256xf32>,
    } else {
    }
    %c0 = arith.constant 0 : index
    %c0_1 = arith.constant 0 : index
    %3 = vector.load %arg1[%c0, %c0_1] : memref<16x32xbf16, #tpu.memory_space<vmem>>, vector<16x32xbf16>
    %c0_2 = arith.constant 0 : index
    %c0_3 = arith.constant 0 : index
    %4 = vector.load %arg2[%c0_2, %c0_3] : memref<32x256xbf16, #tpu.memory_space<vmem>>, vector<32x256xbf16>
    %cst = arith.constant dense<0.000000e+00> : vector<16x256xf32>
    %5 = tpu.matmul %3, %4, %cst {dimension_numbers = #tpu.dot_dimension_numbers<[1], [0], [0], [1], [0, 0, 1, 1], [], []>} : vector<16x32xbf16>, vector<32x256xbf16>, vector<16x256xf32> -> vector<16x256xf32>
    %c0_4 = arith.constant 0 : index
    %c0_5 = arith.constant 0 : index
    %6 = vector.load %arg3[%c0_4, %c0_5] : memref<1x256xf32, #tpu.memory_space<vmem>>, vector<1x256xf32>
    %7 = vector.broadcast %6 : vector<1x256xf32> to vector<16x256xf32>
    %8 = arith.addf %5, %7 : vector<16x256xf32>
    %c0_6 = arith.constant 0 : index
    %c0_7 = arith.constant 0 : index
    %9 = vector.load %arg4[%c0_6, %c0_7] : memref<16x256xf32, #tpu.memory_space<vmem>>, vector<16x256xf32>
    tpu.vector_store %arg4[%c0_6, %c0_7], %8 {strides = array<i32>} : memref<16x256xf32, #tpu.memory_space<vmem>>, vector<16x256xf32>,
    %c0_8 = arith.constant 0 : index
    %c0_9 = arith.constant 0 : index
    %10 = vector.load %arg5[%c0_8, %c0_9] : memref<1x256xf32, #tpu.memory_space<vmem>>, vector<1x256xf32>
    %cst_10 = arith.constant dense<0.000000e+00> : vector<256xf32>
    %11 = vector.multi_reduction <add>, %8, %cst_10 [0] : vector<16x256xf32> to vector<256xf32>
    %12 = vector.shape_cast %11 : vector<256xf32> to vector<1x256xf32>
    %13 = arith.addf %10, %12 : vector<1x256xf32>
    %c0_11 = arith.constant 0 : index
    %c0_12 = arith.constant 0 : index
    %14 = vector.load %arg5[%c0_11, %c0_12] : memref<1x256xf32, #tpu.memory_space<vmem>>, vector<1x256xf32>
    tpu.vector_store %arg5[%c0_11, %c0_12], %13 {strides = array<i32>} : memref<1x256xf32, #tpu.memory_space<vmem>>, vector<1x256xf32>,
    %c0_13 = arith.constant 0 : index
    %c0_14 = arith.constant 0 : index
    %15 = vector.load %arg6[%c0_13, %c0_14] : memref<1x256xf32, #tpu.memory_space<vmem>>, vector<1x256xf32>
    %16 = arith.mulf %8, %8 : vector<16x256xf32>
    %cst_15 = arith.constant dense<0.000000e+00> : vector<256xf32>
    %17 = vector.multi_reduction <add>, %16, %cst_15 [0] : vector<16x256xf32> to vector<256xf32>
    %18 = vector.shape_cast %17 : vector<256xf32> to vector<1x256xf32>
    %19 = arith.addf %15, %18 : vector<1x256xf32>
    %c0_16 = arith.constant 0 : index
    %c0_17 = arith.constant 0 : index
    %20 = vector.load %arg6[%c0_16, %c0_17] : memref<1x256xf32, #tpu.memory_space<vmem>>, vector<1x256xf32>
    tpu.vector_store %arg6[%c0_16, %c0_17], %19 {strides = array<i32>} : memref<1x256xf32, #tpu.memory_space<vmem>>, vector<1x256xf32>,
    return
  }
  func.func @transform_0(%arg0: i32) -> (i32, i32) {
    %c0_i32 = arith.constant 0 : i32
    %c0_i32_0 = arith.constant 0 : i32
    return %arg0, %c0_i32 : i32, i32
  }
  func.func @transform_1(%arg0: i32) -> (i32, i32) {
    %c0_i32 = arith.constant 0 : i32
    %c0_i32_0 = arith.constant 0 : i32
    %c0_i32_1 = arith.constant 0 : i32
    return %c0_i32, %c0_i32_0 : i32, i32
  }
  func.func @transform_2(%arg0: i32) -> (i32, i32) {
    %c0_i32 = arith.constant 0 : i32
    %c0_i32_0 = arith.constant 0 : i32
    %c0_i32_1 = arith.constant 0 : i32
    return %c0_i32, %c0_i32_0 : i32, i32
  }
  func.func @transform_3(%arg0: i32) -> (i32, i32) {
    %c0_i32 = arith.constant 0 : i32
    %c0_i32_0 = arith.constant 0 : i32
    return %arg0, %c0_i32 : i32, i32
  }
  func.func @transform_4(%arg0: i32) -> (i32, i32) {
    %c0_i32 = arith.constant 0 : i32
    %c0_i32_0 = arith.constant 0 : i32
    %c0_i32_1 = arith.constant 0 : i32
    return %c0_i32, %c0_i32_0 : i32, i32
  }
  func.func @transform_5(%arg0: i32) -> (i32, i32) {
    %c0_i32 = arith.constant 0 : i32
    %c0_i32_0 = arith.constant 0 : i32
    %c0_i32_1 = arith.constant 0 : i32
    return %c0_i32, %c0_i32_0 : i32, i32
  }
}

</mosaic_0001>

<bundles_post_ra>
// kernel: tpu_custom_call.1
= control target key start
LH: loop header
LB: loop body
LE: loop exit
PB: predicated region body
PF: predicated region fallthrough
CT: control target
= control target key end

     0   :  { %11 = vsyncpa [#allocation3], 0  ;;  %s931_s0 = inlined_call_operand.vmem [shape: bf16[64,32], index: 0, kind: input, shape index: {}]   ;;  %s932_s1 = inlined_call_operand.vmem [shape: bf16[32,256], index: 1, kind: input, shape index: {}]   ;;  %s933_s2 = inlined_call_operand.vmem [shape: f32[1,256], index: 2, kind: input, shape index: {}]   ;;  %s934_s3 = inlined_call_operand.hbm [shape: f32[64,256], index: 3, kind: output, shape index: {0}]   ;;  %s935_s4 = inlined_call_operand.hbm [shape: f32[1,256], index: 4, kind: output, shape index: {1}]   ;;  %s936_s5 = inlined_call_operand.hbm [shape: f32[1,256], index: 5, kind: output, shape index: {2}]  }
   0x1   :  { %13 = vsyncpa [#allocation3 + $0x1], 0 }
   0x2   :  { %14 = vsyncpa [#allocation5], 0  ;;  %s768_s18 = smov 0   ;;  %s770_s19 = smov 0  }
   0x3   :  { %s772_s20 = smov 0   ;;  %s774_s21 = smov 0  }
   0x4 LB: > { %s789_s22 = sadd.s32 4294967295, %s728_s21   ;;  %s525_s23 = sadd.s32 4294967294, %s728_s21   ;;  %s728_s21 = sphi %s774_s21, %s944_s21   ;;  %s724_s20 = sphi %s772_s20, %s943_s20   ;;  %s720_s19 = sphi %s770_s19, %s942_s19   ;;  %s716_s18 = sphi %s768_s18, %s941_s18  }
   0x5   : > { %s793_s24 = sadd.s32 1, %s728_s21   ;;  %s95_s25 = sadd.s32 1, %s724_s20 }
   0x6   : > { %s92_s26 = ssub.s32 %s728_s21, %s793_s24  ;;  %p105_p0 = scmp.ne.s32.totalorder %s724_s20, %s720_s19 }
   0x7   : > { %p93_p1 = scmp.eq.s32.totalorder %s92_s26, 0  ;;  %p106_p2 = scmp.eq.s32.totalorder %s789_s22, 3 }
   0x8   : > { %p111_p3 = scmp.ne.s32.totalorder %s720_s19, %s716_s18  ;;  %p112_p4 = scmp.eq.s32.totalorder %s525_s23, 3 }
   0x9   : > { %s804_s27 = scalar_select %p93_p1, %s724_s20, %s95_s25  }
   0xa   : > { %p808_p5 = por %p106_p2, %p105_p0  ;;  %p812_p6 = por %p112_p4, %p111_p3 }
   0xb   : > { %p528_p7 = scmp.ge.s32.totalorder %s728_s21, 1  ;;  %p187_p8 = scmp.lt.s32.totalorder %s728_s21, 5 }
   0xd   : > { %p188_p9 = pnand %p528_p7, %p187_p8 }
   0xe   : > { %s208_s30 = sand.u32 (!%p188_p9), 1, %s720_s19   ;;  %s530_s6 = sshll.u32 (!%p188_p9), %s789_s22, 1 }
   0xf   : > { %191 = sbr.rel (%p188_p9) target bundleno = 288 (0x120), region = 32  ;;  %s529_s7 = sshll.u32 (!%p188_p9), %s208_s30, 5 }
  0x10   : > { %p216_p10 = scmp.lt.s32.totalorder (!%p188_p9), %s530_s6, 7  ;;  %s825_s12 = scalar_lea.vmem (!%p188_p9), [#allocation2], %s529_s7 }
  0x11   : > { %p532_p11 = scmp.ne.s32.totalorder (!%p188_p9), %s789_s22, 0 }
  0x14   : > { %s946_s6 = smov (!%p216_p10, %s530_s6), 7  ;;  %226 = sbr.rel (%p532_p11) target bundleno = 29 (0x1d), region = 36 }
  0x15   : > { %s531_s8 = sshll.u32 %s946_s6, 2 }
  0x16   : > { %s219_s11 = scalar_lea.vmem %s931_s0, %s531_s8 }
  0x19   : > { %v227_v0 = vlaneseq  ;;  %v730_v1 = vmov 0.0  }
  0x1b   : > { %vm229_vm0 = vcmp.lt.s32.totalorder %v227_v0, 256 }
  0x1c   : > { %231 = vst.msk [vmem:[#allocation4] sm:$0x3] %vm229_vm0, %v730_v1  ;;  %232 = vst.msk [vmem:[#allocation6] sm:$0x3] %vm229_vm0, %v730_v1 }
  0x1d PF: > { %v609_v2 = vld [vmem:[%s932_s1 + $0x14] ss:$8 sps:$4 sm:$0xff]   ;;  %v611_v3 = vld [vmem:[%s932_s1 + $0x10] ss:$8 sps:$4 sm:$0xff]   ;;  %v731_v4 = vmov 0   ;;  %v615_v7 = vld [vmem:[%s219_s11] sm:$0xff]   ;;  %v241_v8 = vlaneseq }
  0x1e   : > { %312 = vmatprep.mubr.bf16.mxu0 %v731_v4  ;;  %292 = vmatprep.subr.bf16.mxu0 %v609_v2  ;;  %v612_v5 = vld [vmem:[%s932_s1 + $0x4] ss:$8 sps:$4 sm:$0xff]   ;;  %v614_v6 = vld [vmem:[%s932_s1] ss:$8 sps:$4 sm:$0xff]   ;;  %vm276_vm1 = vcmask 261120   ;;  %s550_s8 = sshll.u32 %s789_s22, 9 }
  0x1f   : > { %293 = vmatpush1.bf16.msra.mxu0 %v611_v3  ;;  %v841_v9 = vshrl.u32 %v241_v8, 7  ;;  %v239_v11 = vld [vmem:[%s933_s2] sm:$0x3]  ;;  %s420_s9 = sshll.u32 %s825_s12, 4  ;;  %s855_s13 = scalar_lea.hbm %s934_s3, %s550_s8  ;;  %s857_s9 = int_to_ptr.vmem [resolvable:$true] %s420_s9 }
  0x20   : > { %294 = vmatprep.subr.bf16.mxu0 %v612_v5  ;;  %s863_s14 = scalar_lea.sflag [#allocation3], %s208_s30  ;;  %s616_s15 = scalar_lea.vmem %s857_s9, 512 }
  0x21   : > { %v243_v10 = vsub.s32 0, %v841_v9  ;;  %v247_v12 = vsub.s32 1, %v841_v9  ;;  %p617_p12 = scmp.ne.s32.totalorder %s857_s9, %s616_s15  ;;  %s732_s16 = smov [#allocation2]  }
  0x22   : > { %s620_s17 = sshll.u32 %s732_s16, 4  ;;  %s621_s17 = int_to_ptr.vmem [resolvable:$false] %s620_s17 }
  0x23   : > { %295 = vmatpush1.bf16.msra.mxu0 %v614_v6  ;;  %v244_v13 = vrot.slane %v239_v11, %v243_v10  ;;  %v248_v14 = vrot.slane %v239_v11, %v247_v12  ;;  %p618_p13 = pnand %p617_p12, %p808_p5  ;;  %s622_s23 = scalar_lea.vmem %s621_s17, 1024 }
  0x24   : > { %p623_p1 = scmp.lt.s32.totalorder %s857_s9, %s621_s17  ;;  %p624_p3 = scmp.lt.s32.totalorder %s622_s23, %s616_s15 }
  0x25   : > { %p619_p0 = pneg %p618_p13 }
  0x26   : > { %538 = vmatmul.mubr.msk.bf16.vlgmr.msra.gmra.mxu0 %vm276_vm1, %v615_v7  ;;  %p625_p4 = por %p624_p3, %p623_p1 }
  0x28   : > { %p626_p7 = pnand %p625_p4, %p619_p0 }
  0xe6   : > { %v314_v15 = vpop.f32.mrf.mxu0 }
  0xe7   : > { %v315_v16 = vadd.f32 %v314_v15, %v244_v13 }
  0xe8   : > { %v316_v17 = vpop.f32.mrf.mxu0 }
  0xe9   : > { %323 = vst [vmem:[%s825_s12] sm:$0xff] %v315_v16  ;;  %v317_v18 = vadd.f32 %v316_v17, %v248_v14  ;;  %v367_v22 = vmul.f32 %v315_v16, %v315_v16 }
  0xea   : > { %v318_v19 = vpop.f32.mrf.mxu0 }
  0xeb   : > { %324 = vst [vmem:[%s825_s12 + $0x8] sm:$0xff] %v317_v18  ;;  %v319_v20 = vadd.f32 %v318_v19, %v244_v13  ;;  %v368_v26 = vmul.f32 %v317_v18, %v317_v18 }
  0xec   : > { %v320_v21 = vpop.f32.mrf.mxu0 }
  0xed   : > { %325 = vst [vmem:[%s825_s12 + $0x10] sm:$0xff] %v319_v20  ;;  %v328_v23 = vadd.f32 %v319_v20, %v315_v16  ;;  %v369_v24 = vmul.f32 %v319_v20, %v319_v20  ;;  %v321_v25 = vadd.f32 %v320_v21, %v248_v14 }
  0xef   : > { %v329_v27 = vrot.slane %v328_v23, 4  ;;  %v371_v28 = vadd.f32 %v369_v24, %v367_v22  ;;  %326 = vst [vmem:[%s825_s12 + $0x18] sm:$0xff] %v321_v25  ;;  %v335_v29 = vadd.f32 %v321_v25, %v317_v18  ;;  %v370_v30 = vmul.f32 %v321_v25, %v321_v25 }
  0xf0   : > { %629 = shalt.err (!%p626_p7)
}
  0xf1   : > { %s630_s30 = scalar_lea.hbm %s855_s13, 512  ;;  %s634_s26 = scalar_lea.hbm %s934_s3, 2048 }
  0xf2   : > { %p631_p8 = scmp.ne.s32.totalorder %s855_s13, %s630_s30  ;;  %p635_p11 = scmp.lt.s32.totalorder %s855_s13, %s934_s3 }
  0xf3   : > { %p636_p12 = scmp.lt.s32.totalorder %s634_s26, %s630_s30 }
  0xf4   : > { %p632_p9 = pnand %p631_p8, %p808_p5 }
  0xf5   : > { %p637_p13 = por %p636_p12, %p635_p11 }
  0xf6   : > { %p633_p10 = pneg %p632_p9 }
  0xf8   : > { %p638_p0 = pnand %p637_p13, %p633_p10 }
  0xfa   : > { %641 = shalt.err (!%p638_p0)
}
  0xfb   : > { %s733_s8 = smov 256   ;;  %s734_s10 = smov 16   ;;  %v330_v31 = vadd.f32 %v329_v27, %v328_v23  ;;  %v372_v32 = vrot.slane %v371_v28, 4  ;;  %v336_v33 = vrot.slane %v335_v29, 4  ;;  %v378_v34 = vadd.f32 %v370_v30, %v368_v26  ;;  %v327_v62 = vld [vmem:[#allocation4] sm:$0x3] }
  0xfc   : > { %551 = dma.vmem_to_hbm [thread:$0]  (%p808_p5), %s857_s9, 512, %s855_s13, %s863_s14, %s733_s8, %s733_s8, %s734_s10   ;;  %v735_v35 = vmov 1966171168   ;;  %vm888_vm2 = vcmp.lt.s32.totalorder %v241_v8, 256  ;;  %v366_v2 = vld [vmem:[#allocation6] sm:$0x3] }
  0xfd   : > { %v346_v36 = vunpack.c.l.s4 %v735_v35  ;;  %v331_v37 = vrot.slane %v330_v31, 2  ;;  %v373_v38 = vadd.f32 %v372_v32, %v371_v28  ;;  %v337_v39 = vadd.f32 %v336_v33, %v335_v29  ;;  %s736_s28 = smov [#allocation4]   ;;  %s737_s11 = smov [#allocation6]  }
  0xfe   : > { %v379_v40 = vrot.slane %v378_v34, 4  ;;  %s434_s9 = sshll.u32 %s736_s28, 4  ;;  %s445_s13 = sshll.u32 %s737_s11, 4  ;;  %s435_s9 = int_to_ptr.vmem [resolvable:$true] %s434_s9  ;;  %s446_s13 = int_to_ptr.vmem [resolvable:$true] %s445_s13 }
  0xff   : > { %v332_v41 = vadd.f32 %v331_v37, %v330_v31  ;;  %v374_v42 = vrot.slane %v373_v38, 2  ;;  %v338_v43 = vrot.slane %v337_v39, 2  ;;  %v347_v45 = vunpack.c.0.s8 %v346_v36  ;;  %s642_s14 = scalar_lea.vmem %s435_s9, 32  ;;  %p649_p4 = scmp.lt.s32.totalorder %s435_s9, %s435_s9 }
 0x100   : > { %v380_v44 = vadd.f32 %v379_v40, %v378_v34  ;;  %p643_p5 = scmp.ne.s32.totalorder %s435_s9, %s642_s14  ;;  %p650_p7 = scmp.lt.s32.totalorder %s642_s14, %s642_s14 }
 0x101   : > { %v333_v46 = vrot.slane %v332_v41, 1  ;;  %v375_v47 = vadd.f32 %v374_v42, %v373_v38  ;;  %v339_v48 = vadd.f32 %v338_v43, %v337_v39  ;;  %v350_v53 = vsub.s32 %v347_v45, %v841_v9 }
 0x102   : > { %v381_v49 = vrot.slane %v380_v44, 2  ;;  %p644_p1 = pnand %p643_p5, %p106_p2  ;;  %p651_p8 = por %p650_p7, %p649_p4 }
 0x103   : > { %v376_v50 = vrot.slane %v375_v47, 1  ;;  %v340_v51 = vrot.slane %v339_v48, 1  ;;  %v334_v54 = vadd.f32 %v333_v46, %v332_v41 }
 0x104   : > { %v382_v52 = vadd.f32 %v381_v49, %v380_v44  ;;  %p645_p3 = pneg %p644_p1 }
 0x105   : > { %v341_v55 = vadd.f32 %v340_v51, %v339_v48  ;;  %v377_v58 = vadd.f32 %v376_v50, %v375_v47 }
 0x106   : > { %v383_v56 = vrot.slane %v382_v52, 1  ;;  %p652_p9 = pnand %p651_p8, %p645_p3 }
 0x107   : > { %v344_v57 = vcombine.low %v334_v54, %v341_v55 }
 0x108   : > { %v384_v59 = vadd.f32 %v383_v56, %v382_v52 }
 0x109   : > { %v351_v60 = vrot.slane %v344_v57, %v350_v53 }
 0x10a   : > { %v387_v61 = vcombine.low %v377_v58, %v384_v59 }
 0x10b   : > { %v358_v63 = vrot.slane %v351_v60, %v350_v53 }
 0x10c   : > { %v394_v0 = vrot.slane %v387_v61, %v350_v53 }
 0x10d   : > { %v360_v3 = vadd.f32 %v358_v63, %v327_v62 }
 0x10e   : > { %v401_v4 = vrot.slane %v394_v0, %v350_v53 }
 0x10f   : > { %365 = vst.msk [vmem:[#allocation4] sm:$0x3] %vm888_vm2, %v360_v3 }
 0x110   : > { %v403_v5 = vadd.f32 %v401_v4, %v366_v2 }
 0x111   : > { %655 = shalt.err (!%p652_p9)
}
 0x112   : > { %553 = dma.vmem_to_hbm [thread:$0]  (%p106_p2), %s435_s9, 32, %s935_s4, [#allocation5]   ;;  %404 = vst.msk [vmem:[#allocation6] sm:$0x3] %vm888_vm2, %v403_v5 }
 0x113   : > { %s666_s17 = scalar_lea.vmem %s446_s13, 32  ;;  %p673_p13 = scmp.lt.s32.totalorder %s446_s13, %s446_s13 }
 0x114   : > { %p667_p10 = scmp.ne.s32.totalorder %s446_s13, %s666_s17  ;;  %p674_p0 = scmp.lt.s32.totalorder %s666_s17, %s666_s17 }
 0x116   : > { %p668_p11 = pnand %p667_p10, %p106_p2  ;;  %p675_p5 = por %p674_p0, %p673_p13 }
 0x118   : > { %p669_p12 = pneg %p668_p11 }
 0x11a   : > { %p676_p1 = pnand %p675_p5, %p669_p12 }
 0x11c   : > { %679 = shalt.err (!%p676_p1)
}
 0x11d   : > { %555 = dma.vmem_to_hbm [thread:$0]  (%p106_p2), %s446_s13, 32, %s936_s5, [#allocation5]  }
 0x11e   : > { %707 = dma.done.wait (%p106_p2), [#allocation5], 64  }
 0x11f   : > { %709 = vsyncadd (%p106_p2), [#allocation5], 4294967232 }
 0x120 PF: > { %p569_p3 = scmp.ge.s32.totalorder %s728_s21, 2  ;;  %s465_s12 = sand.u32 1, %s716_s18  }
 0x121   : > { %s466_s25 = scalar_lea.sflag [#allocation3], %s465_s12 }
 0x122   : > { %p562_p4 = pnand %p569_p3, %p812_p6 }
 0x124   : > { %p563_p7 = pneg %p562_p4 }
 0x126   : > { %711 = dma.done.wait (%p563_p7), %s466_s25, 512  }
 0x127   : > { %713 = vsyncadd (%p563_p7), %s466_s25, 4294966784  ;;  %p17_p8 = scmp.ge.s32.totalorder %s793_s24, 6   ;;  %s941_s18 = smov %s720_s19 }
 0x128   : > { %s942_s19 = smov %s724_s20  ;;  %s943_s20 = smov %s804_s27 }
 0x129   : > { %s944_s21 = smov %s793_s24  ;;  %19 = sbr.rel (!%p17_p8) target bundleno = 4 (0x4), region = 87 }
 0x12e   :  { %471 = vsyncpa [#allocation3], 1 }
 0x12f   :  { %473 = vsyncpa [#allocation3 + $0x1], 1 }
 0x130   :  { %474 = vsyncpa [#allocation5], 1 }

</bundles_post_ra>
